<compile_context>
chip_gen: v7x
topology: tpu7x:2x2x1
jax: 0.10.0
libtpu: 0.0.40
codegen_flags: <defaults>
</compile_context>

<pallas_src>
import functools
import math

import jax
import jax.numpy as jnp
from jax import lax
from jax.experimental import pallas as pl
from jax.experimental.pallas import tpu as pltpu


def _cook_torrance_kernel(n_lobes, background, eps_vis, approx_recip,
                          params_ref, packed_ref, out_ref):
    """Shades one (batch, pixel-tile) block.

    packed_ref: (C, r_tile, 128) channels-first, lane-dense
        0        foreground mask (pix_to_face >= 0)
        1:4      interpolated pixel position (zeroed for background pixels)
        4:7      interpolated pixel normal   (zeroed for background pixels)
        7:10     diffuse albedo rgb
        10:10+L            roughness per lobe
        10+L:10+2L         specular albedo per lobe
        10+2L:10+3L        fresnel r0 per lobe
    params_ref: (N, 9) SMEM [light_loc xyz, camera_center xyz, light_rgb]
    out_ref:    (4, r_tile, 128) RGBA (channels-first, lane-dense)
    """
    n = pl.program_id(0)
    lx, ly, lz = params_ref[n, 0], params_ref[n, 1], params_ref[n, 2]
    cx, cy, cz = params_ref[n, 3], params_ref[n, 4], params_ref[n, 5]
    ldr, ldg, ldb = params_ref[n, 6], params_ref[n, 7], params_ref[n, 8]

    def row(i):  # static channel slice, upcast (inputs may be bf16)
        return packed_ref[i, :, :].astype(jnp.float32)

    def recip(x):
        if approx_recip:
            return pl.reciprocal(x, approx=True)   # EUP slot, nearly free
        return 1.0 / x

    mask = row(0)
    px, py, pz = row(1), row(2), row(3)
    nx, ny, nz = row(4), row(5), row(6)
    dif_r, dif_g, dif_b = row(7), row(8), row(9)
    tR = 10                    # roughness base channel
    tS = 10 + n_lobes          # specular-albedo base channel
    tF = 10 + 2 * n_lobes      # r0 base channel

    # PointLights / camera directions (unnormalized).
    Lx, Ly, Lz = lx - px, ly - py, lz - pz
    Vx, Vy, Vz = cx - px, cy - py, cz - pz

    # Consume the unnormalized vectors first so their live ranges end early.
    forward_facing = (nx * Vx + ny * Vy + nz * Vz) > eps_vis
    dist_sq = jnp.maximum(Lx * Lx + Ly * Ly + Lz * Lz, 1e-12)

    def normalize3(ax, ay, az):
        inv = lax.rsqrt(jnp.maximum(ax * ax + ay * ay + az * az, 1e-24))
        return ax * inv, ay * inv, az * inv

    nxu, nyu, nzu = normalize3(nx, ny, nz)
    lxu, lyu, lzu = normalize3(Lx, Ly, Lz)
    vxu, vyu, vzu = normalize3(Vx, Vy, Vz)

    # n.l reused for both the diffuse falloff and the specular i_n term.
    n_dot_l = nxu * lxu + nyu * lyu + nzu * lzu
    visible = (n_dot_l > 0.0) & forward_facing
    falloff = jnp.where(visible, n_dot_l, 0.0)
    i_n = jnp.maximum(n_dot_l, 1e-6)

    # Cook-Torrance specular term.
    hxu, hyu, hzu = normalize3(lxu + vxu, lyu + vyu, lzu + vzu)
    h_n = jnp.maximum(hxu * nxu + hyu * nyu + hzu * nzu, 1e-6)
    cos_a2 = h_n * h_n
    v_n = jnp.maximum(lxu * vxu + lyu * vyu + lzu * vzu, 1e-6)
    v_h = jnp.maximum(hxu * vxu + hyu * vyu + hzu * vzu, 1e-6)
    G = jnp.minimum(jnp.minimum(i_n, v_n) * (2.0 * h_n) * recip(v_h), 1.0)
    omvh = 1.0 - v_h
    omvh2 = omvh * omvh
    omvh5 = omvh2 * omvh2 * omvh
    inv_pi = 1.0 / math.pi
    # G / (pi * i_n * v_n), folded.
    base = G * recip(math.pi * (i_n * v_n))

    spec = jnp.zeros_like(h_n)
    for l in range(n_lobes):                       # static unroll over lobes
        rough = row(tR + l)
        s_alb = row(tS + l)
        r0 = row(tF + l)
        rsq = rough * rough
        dden = cos_a2 * (rsq - 1.0) + 1.0
        Dterm = (rsq * inv_pi) * recip(dden * dden)
        Fterm = r0 + (1.0 - r0) * omvh5
        spec = spec + (Dterm * Fterm) * (base * s_alb)

    # irradiance with point-light 1/|L|^2 attenuation.
    scale = falloff * recip(dist_sq)
    col_r = (dif_r + spec) * (scale * ldr)
    col_g = (dif_g + spec) * (scale * ldg)
    col_b = (dif_b + spec) * (scale * ldb)

    # hard_rgb_blend with the closest face.
    is_fg = mask > 0.0
    out_ref[0, :, :] = jnp.where(is_fg, col_r, background[0])
    out_ref[1, :, :] = jnp.where(is_fg, col_g, background[1])
    out_ref[2, :, :] = jnp.where(is_fg, col_b, background[2])
    out_ref[3, :, :] = mask  # alpha = (~is_background)


def _choose_row_tile(num_rows, want_rows, sublane, n_batch):
    """Row tile: multiple of `sublane`, as big as requested, but the grid keeps
    >= 2 row blocks when N == 1 (both v7x TensorCores stay busy)."""
    if num_rows <= sublane:
        return num_rows
    r = min(max(sublane, want_rows), num_rows)
    if n_batch == 1:
        half = (pl.cdiv(num_rows, 2) // sublane) * sublane
        if half >= sublane:
            r = min(r, half)
    if r >= num_rows:
        return num_rows
    return max(sublane, (r // sublane) * sublane)


def hard_cook_torrance_shader(pix_to_face, bary_coords, verts, faces,
                              vert_normals, vert_textures,
                              light_location, light_diffuse_color,
                              camera_center, *, n_lobes,
                              background_color=(1.0, 1.0, 1.0),
                              tile_pixels=32768,
                              input_dtype=jnp.bfloat16,
                              approx_reciprocal=True,
                              input_buffers=2):
    """Pallas implementation of HardCookTorranceShader.forward -> (N,H,W,4)."""
    N, H, W, K = pix_to_face.shape
    Dtex = 3 + 3 * n_lobes
    assert vert_textures.shape[-1] == Dtex

    # ---- plain-JAX glue: data-dependent gathers + barycentric interpolation.
    # TODO(synk): the face-index gathers (verts[faces][pix_to_face]) have no
    # clean BlockSpec equivalent, so they stay in XLA.
    # hard_rgb_blend only uses the closest face, so only K = 0 is shaded.
    p2f = pix_to_face[..., 0]                                   # (N,H,W)
    bary = bary_coords[..., 0, :].astype(jnp.float32)           # (N,H,W,3)
    mask = p2f >= 0
    bary = jnp.where(mask[..., None], bary, 0.0)                # mask folded in

    fidx = jnp.clip(p2f, 0, None)
    vert_attr = jnp.concatenate(
        [verts.astype(jnp.float32), vert_normals.astype(jnp.float32),
         vert_textures.astype(jnp.float32)], axis=-1)           # (V, 6+Dtex)
    face_attr = vert_attr[faces]                                # (F, 3, 6+Dtex)
    pix_attr = face_attr[fidx]                                  # (N,H,W,3,6+Dtex)
    # interpolate_face_attributes / sample_textures in one pass (bary masked).
    interp = (bary[..., None] * pix_attr).sum(-2)               # (N,H,W,6+Dtex)

    # ---- ONE channels-last concat + ONE transpose into (N, C, R, 128). -----
    HW = H * W
    C = 7 + Dtex                                                # 10 + 3*n_lobes
    packed_cl = jnp.concatenate(
        [mask.astype(jnp.float32)[..., None], interp], axis=-1)  # (N,H,W,C)
    packed_cl = packed_cl.reshape(N, HW, C).astype(input_dtype)

    lanes = 128
    itemsize = jnp.dtype(input_dtype).itemsize
    sublane = max(8, 32 // itemsize)              # 8 f32 / 16 bf16 / 32 int8
    R0 = pl.cdiv(HW, lanes)
    r_tile = _choose_row_tile(R0, max(1, tile_pixels // lanes), sublane, N)
    R = pl.cdiv(R0, r_tile) * r_tile
    HWp = R * lanes
    if HWp != HW:
        packed_cl = jnp.pad(packed_cl, ((0, 0), (0, HWp - HW), (0, 0)))
    packed = packed_cl.reshape(N, R, lanes, C).transpose(0, 3, 1, 2)  # (N,C,R,128)

    # Per-batch scalars: light location, camera center, light diffuse color.
    params = jnp.concatenate(
        [light_location, camera_center, light_diffuse_color],
        axis=-1).astype(jnp.float32)                            # (N, 9)

    packed_spec_kw = {}
    if input_buffers != 2:           # e.g. 3 on v5e to keep the DMA stream ahead
        packed_spec_kw["pipeline_mode"] = pl.Buffered(int(input_buffers))
    in_specs = [
        pl.BlockSpec(memory_space=pltpu.MemorySpace.SMEM),      # per-batch scalars
        pl.BlockSpec((None, C, r_tile, lanes), lambda n, i: (n, 0, i, 0),
                     **packed_spec_kw),
    ]
    out_spec = pl.BlockSpec((None, 4, r_tile, lanes), lambda n, i: (n, 0, i, 0))

    kernel = functools.partial(
        _cook_torrance_kernel, int(n_lobes),
        tuple(float(c) for c in background_color), 1e-12,
        bool(approx_reciprocal))

    cost = pl.CostEstimate(
        flops=int((130 + 30 * n_lobes) * N * HWp),
        transcendentals=int((6 + n_lobes) * N * HWp),
        bytes_accessed=int(N * HWp * (C * itemsize + 4 * 4) + N * 9 * 4))

    # Only raise the scoped-VMEM limit when the working set needs it
    # (scoped defaults: v5e 16 MiB, v6e/v7x 32 MiB; cap well under v7x 64 MiB).
    block_bytes = (max(2, int(input_buffers)) * C * r_tile * lanes * itemsize
                   + 2 * 4 * r_tile * lanes * 4)
    cp_kwargs = dict(dimension_semantics=("parallel", "parallel"))
    if block_bytes > (12 << 20):
        cp_kwargs["vmem_limit_bytes"] = int(min(block_bytes + (8 << 20), 48 << 20))

    out = pl.pallas_call(
        kernel,
        out_shape=jax.ShapeDtypeStruct((N, 4, R, lanes), jnp.float32),
        grid_spec=pltpu.PrefetchScalarGridSpec(
            num_scalar_prefetch=0,
            grid=(N, R // r_tile),
            in_specs=in_specs,
            out_specs=out_spec),
        compiler_params=pltpu.CompilerParams(**cp_kwargs),
        cost_estimate=cost,
    )(params, packed)

    img = out.reshape(N, 4, HWp)[:, :, :HW]                     # (N,4,HW)
    return img.transpose(0, 2, 1).reshape(N, H, W, 4)


def hard_cook_torrance_ref(pix_to_face, bary_coords, verts, faces,
                           vert_normals, vert_textures,
                           light_location, light_diffuse_color, camera_center,
                           *, n_lobes, background_color=(1.0, 1.0, 1.0)):
    """Pure-JAX reference mirroring the PyTorch module (all K, then hard blend)."""
    eps = 1e-12
    N, H, W, K = pix_to_face.shape
    Dtex = 3 + 3 * n_lobes
    mask = pix_to_face >= 0
    fidx = jnp.clip(pix_to_face, 0, None)
    fv = verts[faces][fidx]
    fn = vert_normals[faces][fidx]
    ft = vert_textures[faces][fidx]

    def interp(attr):
        vals = (bary_coords[..., None] * attr).sum(-2)
        return jnp.where(mask[..., None], vals, 0.0)

    points = interp(fv).reshape(N, -1, 3)
    normals = interp(fn).reshape(N, -1, 3)
    texels = interp(ft).reshape(N, -1, Dtex)

    light_dirs = light_location[:, None, :] - points
    view_dirs = camera_center[:, None, :] - points

    def normalize(x):
        nrm = jnp.sqrt((x * x).sum(-1, keepdims=True))
        return x / jnp.maximum(nrm, 1e-12)

    n_ = normalize(normals)
    l_ = normalize(light_dirs)
    v_ = normalize(view_dirs)
    falloff = (n_ * l_).sum(-1)
    forward_facing = (normals * view_dirs).sum(-1) > eps
    visible = (falloff > 0) & forward_facing
    falloff = jnp.where(visible, falloff, 0.0)

    diffuse_albedo = texels[..., 0:3]
    roughness = texels[..., 3:3 + n_lobes]
    spec_albedo = texels[..., 3 + n_lobes:3 + 2 * n_lobes]
    r0 = texels[..., 3 + 2 * n_lobes:3 + 3 * n_lobes]

    h_ = normalize(l_ + v_)
    h_n = jnp.maximum((h_ * n_).sum(-1), 1e-6)
    cos_a2 = (h_n ** 2)[..., None]
    rsq = roughness ** 2
    Dt = rsq / jnp.pi / (cos_a2 * (rsq - 1.0) + 1.0) ** 2
    v_n = jnp.maximum((l_ * v_).sum(-1), 1e-6)
    v_h = jnp.maximum((h_ * v_).sum(-1), 1e-6)
    i_n = jnp.maximum((l_ * n_).sum(-1), 1e-6)
    G = jnp.minimum(jnp.minimum(i_n, v_n) * 2.0 * h_n / v_h, 1.0)[..., None]
    F = r0 + (1.0 - r0) * (1.0 - v_h[..., None]) ** 5
    ct = Dt * F * G / (jnp.pi * i_n * v_n)[..., None]
    spec_refl = (ct * spec_albedo).sum(-1, keepdims=True)

    irradiance = falloff[..., None] * light_diffuse_color[:, None, :]
    dist_sq = jnp.maximum((light_dirs * light_dirs).sum(-1, keepdims=True), eps)
    diffuse = diffuse_albedo * irradiance / dist_sq
    specular = spec_refl * irradiance / dist_sq
    colors = (diffuse + specular).reshape(N, H, W, K, 3)

    is_bg = pix_to_face[..., 0] < 0
    bg = jnp.asarray(background_color, jnp.float32)
    rgb = jnp.where(is_bg[..., None], bg, colors[..., 0, :])
    alpha = (~is_bg).astype(jnp.float32)[..., None]
    return jnp.concatenate([rgb, alpha], axis=-1)


if __name__ == "__main__":
    key = jax.random.PRNGKey(0)
    ks = jax.random.split(key, 8)

    # Small forward-consistent shapes: N=2, H=W=16, K=4 faces/pixel, 2 lobes.
    N, H, W, K = 2, 16, 16, 4
    V, F = 24, 40
    n_lobes = 2
    Dtex = 3 + 3 * n_lobes

    verts = jax.random.normal(ks[0], (V, 3), jnp.float32)
    vnorm = jax.random.normal(ks[1], (V, 3), jnp.float32)
    vnorm = vnorm / jnp.linalg.norm(vnorm, axis=-1, keepdims=True)
    vtex = jax.random.uniform(ks[2], (V, Dtex), jnp.float32, 0.05, 1.0)
    vtex = vtex.at[:, 3:3 + n_lobes].set(
        jax.random.uniform(ks[3], (V, n_lobes), jnp.float32, 0.2, 0.9))    # roughness
    vtex = vtex.at[:, 3 + 2 * n_lobes:].set(
        jax.random.uniform(ks[4], (V, n_lobes), jnp.float32, 0.02, 0.3))   # r0

    faces = jax.random.randint(ks[5], (F, 3), 0, V, dtype=jnp.int32)
    pix_to_face = jax.random.randint(ks[6], (N, H, W, K), -1, F, dtype=jnp.int32)
    bary = jax.random.uniform(ks[7], (N, H, W, K, 3), jnp.float32, 1e-3, 1.0)
    bary = bary / bary.sum(-1, keepdims=True)

    light_location = jnp.array([[2.0, 3.0, 4.0], [-3.0, 2.0, 5.0]], jnp.float32)
    camera_center = jnp.array([[0.0, 0.0, 5.0], [1.0, -1.0, 6.0]], jnp.float32)
    light_diffuse = jnp.array([[0.9, 0.8, 0.7], [0.6, 0.7, 0.9]], jnp.float32)
    background = (1.0, 1.0, 1.0)

    ref = hard_cook_torrance_ref(
        pix_to_face, bary, verts, faces, vnorm, vtex,
        light_location, light_diffuse, camera_center,
        n_lobes=n_lobes, background_color=background)

    # Exact path: f32 packed inputs, exact reciprocals -> tight comparison.
    out_exact = hard_cook_torrance_shader(
        pix_to_face, bary, verts, faces, vnorm, vtex,
        light_location, light_diffuse, camera_center,
        n_lobes=n_lobes, background_color=background,
        input_dtype=jnp.float32, approx_reciprocal=False)
    out_exact = jax.block_until_ready(out_exact)
    assert out_exact.shape == (N, H, W, 4) and out_exact.dtype == jnp.float32
    if not jnp.allclose(out_exact, ref, rtol=2e-3, atol=1e-4):
        err = float(jnp.max(jnp.abs(out_exact - ref)))
        raise AssertionError(f"exact-path mismatch vs reference (max abs err {err})")

    # Fast path (defaults: bf16 packed inputs + EUP approx reciprocals).
    # Tolerance is loose because the inputs are quantized to bf16 before shading.
    out_fast = hard_cook_torrance_shader(
        pix_to_face, bary, verts, faces, vnorm, vtex,
        light_location, light_diffuse, camera_center,
        n_lobes=n_lobes, background_color=background)
    out_fast = jax.block_until_ready(out_fast)
    assert out_fast.shape == (N, H, W, 4) and out_fast.dtype == jnp.float32
    if not jnp.allclose(out_fast, ref, rtol=1e-1, atol=3e-2):
        err = float(jnp.max(jnp.abs(out_fast - ref)))
        raise AssertionError(f"bf16 fast-path mismatch vs reference (max abs err {err})")

    print("KERNEL_OK")
</pallas_src>

<mosaic_0001>
module attributes {stable_mosaic.version = 11 : i64} {
  func.func @_cook_torrance_kernel(%arg0: i32, %arg1: i32, %arg2: memref<2x9xf32, #tpu.memory_space<smem>>, %arg3: memref<1x16x2x128xf32, #tpu.memory_space<vmem>>, %arg4: memref<1x4x2x128xf32, #tpu.memory_space<vmem>>) attributes {dimension_semantics = [#tpu.dimension_semantics<parallel>, #tpu.dimension_semantics<parallel>], iteration_bounds = array<i64: 2, 1>, scalar_prefetch = 0 : i64, scratch_operands = 0 : i64, tpu.core_type = #tpu.core_type<tc>, window_params = [{transform_indices = @transform_0, window_bounds = array<i64: 2, 9>}, {transform_indices = @transform_1, window_bounds = array<i64: 1, 16, 2, 128>}, {transform_indices = @transform_2, window_bounds = array<i64: 1, 4, 2, 128>}]} {
    %0 = arith.index_cast %arg0 : i32 to index
    %c0 = arith.constant 0 : index
    %1 = memref.load %arg2[%0, %c0] : memref<2x9xf32, #tpu.memory_space<smem>>
    %2 = arith.index_cast %arg0 : i32 to index
    %c1 = arith.constant 1 : index
    %3 = memref.load %arg2[%2, %c1] : memref<2x9xf32, #tpu.memory_space<smem>>
    %4 = arith.index_cast %arg0 : i32 to index
    %c2 = arith.constant 2 : index
    %5 = memref.load %arg2[%4, %c2] : memref<2x9xf32, #tpu.memory_space<smem>>
    %6 = arith.index_cast %arg0 : i32 to index
    %c3 = arith.constant 3 : index
    %7 = memref.load %arg2[%6, %c3] : memref<2x9xf32, #tpu.memory_space<smem>>
    %8 = arith.index_cast %arg0 : i32 to index
    %c4 = arith.constant 4 : index
    %9 = memref.load %arg2[%8, %c4] : memref<2x9xf32, #tpu.memory_space<smem>>
    %10 = arith.index_cast %arg0 : i32 to index
    %c5 = arith.constant 5 : index
    %11 = memref.load %arg2[%10, %c5] : memref<2x9xf32, #tpu.memory_space<smem>>
    %12 = arith.index_cast %arg0 : i32 to index
    %c6 = arith.constant 6 : index
    %13 = memref.load %arg2[%12, %c6] : memref<2x9xf32, #tpu.memory_space<smem>>
    %14 = arith.index_cast %arg0 : i32 to index
    %c7 = arith.constant 7 : index
    %15 = memref.load %arg2[%14, %c7] : memref<2x9xf32, #tpu.memory_space<smem>>
    %16 = arith.index_cast %arg0 : i32 to index
    %c8 = arith.constant 8 : index
    %17 = memref.load %arg2[%16, %c8] : memref<2x9xf32, #tpu.memory_space<smem>>
    %c0_0 = arith.constant 0 : index
    %c0_1 = arith.constant 0 : index
    %c0_2 = arith.constant 0 : index
    %c0_3 = arith.constant 0 : index
    %18 = vector.load %arg3[%c0_0, %c0_1, %c0_2, %c0_3] : memref<1x16x2x128xf32, #tpu.memory_space<vmem>>, vector<1x1x2x128xf32>
    %19 = vector.shape_cast %18 : vector<1x1x2x128xf32> to vector<2x128xf32>
    %c0_4 = arith.constant 0 : index
    %c1_5 = arith.constant 1 : index
    %c0_6 = arith.constant 0 : index
    %c0_7 = arith.constant 0 : index
    %20 = vector.load %arg3[%c0_4, %c1_5, %c0_6, %c0_7] : memref<1x16x2x128xf32, #tpu.memory_space<vmem>>, vector<1x1x2x128xf32>
    %21 = vector.shape_cast %20 : vector<1x1x2x128xf32> to vector<2x128xf32>
    %c0_8 = arith.constant 0 : index
    %c2_9 = arith.constant 2 : index
    %c0_10 = arith.constant 0 : index
    %c0_11 = arith.constant 0 : index
    %22 = vector.load %arg3[%c0_8, %c2_9, %c0_10, %c0_11] : memref<1x16x2x128xf32, #tpu.memory_space<vmem>>, vector<1x1x2x128xf32>
    %23 = vector.shape_cast %22 : vector<1x1x2x128xf32> to vector<2x128xf32>
    %c0_12 = arith.constant 0 : index
    %c3_13 = arith.constant 3 : index
    %c0_14 = arith.constant 0 : index
    %c0_15 = arith.constant 0 : index
    %24 = vector.load %arg3[%c0_12, %c3_13, %c0_14, %c0_15] : memref<1x16x2x128xf32, #tpu.memory_space<vmem>>, vector<1x1x2x128xf32>
    %25 = vector.shape_cast %24 : vector<1x1x2x128xf32> to vector<2x128xf32>
    %c0_16 = arith.constant 0 : index
    %c4_17 = arith.constant 4 : index
    %c0_18 = arith.constant 0 : index
    %c0_19 = arith.constant 0 : index
    %26 = vector.load %arg3[%c0_16, %c4_17, %c0_18, %c0_19] : memref<1x16x2x128xf32, #tpu.memory_space<vmem>>, vector<1x1x2x128xf32>
    %27 = vector.shape_cast %26 : vector<1x1x2x128xf32> to vector<2x128xf32>
    %c0_20 = arith.constant 0 : index
    %c5_21 = arith.constant 5 : index
    %c0_22 = arith.constant 0 : index
    %c0_23 = arith.constant 0 : index
    %28 = vector.load %arg3[%c0_20, %c5_21, %c0_22, %c0_23] : memref<1x16x2x128xf32, #tpu.memory_space<vmem>>, vector<1x1x2x128xf32>
    %29 = vector.shape_cast %28 : vector<1x1x2x128xf32> to vector<2x128xf32>
    %c0_24 = arith.constant 0 : index
    %c6_25 = arith.constant 6 : index
    %c0_26 = arith.constant 0 : index
    %c0_27 = arith.constant 0 : index
    %30 = vector.load %arg3[%c0_24, %c6_25, %c0_26, %c0_27] : memref<1x16x2x128xf32, #tpu.memory_space<vmem>>, vector<1x1x2x128xf32>
    %31 = vector.shape_cast %30 : vector<1x1x2x128xf32> to vector<2x128xf32>
    %c0_28 = arith.constant 0 : index
    %c7_29 = arith.constant 7 : index
    %c0_30 = arith.constant 0 : index
    %c0_31 = arith.constant 0 : index
    %32 = vector.load %arg3[%c0_28, %c7_29, %c0_30, %c0_31] : memref<1x16x2x128xf32, #tpu.memory_space<vmem>>, vector<1x1x2x128xf32>
    %33 = vector.shape_cast %32 : vector<1x1x2x128xf32> to vector<2x128xf32>
    %c0_32 = arith.constant 0 : index
    %c8_33 = arith.constant 8 : index
    %c0_34 = arith.constant 0 : index
    %c0_35 = arith.constant 0 : index
    %34 = vector.load %arg3[%c0_32, %c8_33, %c0_34, %c0_35] : memref<1x16x2x128xf32, #tpu.memory_space<vmem>>, vector<1x1x2x128xf32>
    %35 = vector.shape_cast %34 : vector<1x1x2x128xf32> to vector<2x128xf32>
    %c0_36 = arith.constant 0 : index
    %c9 = arith.constant 9 : index
    %c0_37 = arith.constant 0 : index
    %c0_38 = arith.constant 0 : index
    %36 = vector.load %arg3[%c0_36, %c9, %c0_37, %c0_38] : memref<1x16x2x128xf32, #tpu.memory_space<vmem>>, vector<1x1x2x128xf32>
    %37 = vector.shape_cast %36 : vector<1x1x2x128xf32> to vector<2x128xf32>
    %38 = vector.broadcast %1 : f32 to vector<2x128xf32>
    %39 = arith.subf %38, %21 : vector<2x128xf32>
    %40 = vector.broadcast %3 : f32 to vector<2x128xf32>
    %41 = arith.subf %40, %23 : vector<2x128xf32>
    %42 = vector.broadcast %5 : f32 to vector<2x128xf32>
    %43 = arith.subf %42, %25 : vector<2x128xf32>
    %44 = vector.broadcast %7 : f32 to vector<2x128xf32>
    %45 = arith.subf %44, %21 : vector<2x128xf32>
    %46 = vector.broadcast %9 : f32 to vector<2x128xf32>
    %47 = arith.subf %46, %23 : vector<2x128xf32>
    %48 = vector.broadcast %11 : f32 to vector<2x128xf32>
    %49 = arith.subf %48, %25 : vector<2x128xf32>
    %50 = arith.mulf %27, %45 : vector<2x128xf32>
    %51 = arith.mulf %29, %47 : vector<2x128xf32>
    %52 = arith.addf %50, %51 : vector<2x128xf32>
    %53 = arith.mulf %31, %49 : vector<2x128xf32>
    %54 = arith.addf %52, %53 : vector<2x128xf32>
    %cst = arith.constant 9.99999996E-13 : f32
    %55 = vector.broadcast %cst : f32 to vector<2x128xf32>
    %56 = arith.cmpf ogt, %54, %55 : vector<2x128xf32>
    %57 = arith.mulf %39, %39 : vector<2x128xf32>
    %58 = arith.mulf %41, %41 : vector<2x128xf32>
    %59 = arith.addf %57, %58 : vector<2x128xf32>
    %60 = arith.mulf %43, %43 : vector<2x128xf32>
    %61 = arith.addf %59, %60 : vector<2x128xf32>
    %cst_39 = arith.constant 9.99999996E-13 : f32
    %62 = vector.broadcast %cst_39 : f32 to vector<2x128xf32>
    %63 = arith.maximumf %61, %62 : vector<2x128xf32>
    %64 = arith.mulf %27, %27 : vector<2x128xf32>
    %65 = arith.mulf %29, %29 : vector<2x128xf32>
    %66 = arith.addf %64, %65 : vector<2x128xf32>
    %67 = arith.mulf %31, %31 : vector<2x128xf32>
    %68 = arith.addf %66, %67 : vector<2x128xf32>
    %cst_40 = arith.constant 1.000000e-24 : f32
    %69 = vector.broadcast %cst_40 : f32 to vector<2x128xf32>
    %70 = arith.maximumf %68, %69 : vector<2x128xf32>
    %71 = math.rsqrt %70 : vector<2x128xf32>
    %72 = arith.mulf %27, %71 : vector<2x128xf32>
    %73 = arith.mulf %29, %71 : vector<2x128xf32>
    %74 = arith.mulf %31, %71 : vector<2x128xf32>
    %75 = arith.mulf %39, %39 : vector<2x128xf32>
    %76 = arith.mulf %41, %41 : vector<2x128xf32>
    %77 = arith.addf %75, %76 : vector<2x128xf32>
    %78 = arith.mulf %43, %43 : vector<2x128xf32>
    %79 = arith.addf %77, %78 : vector<2x128xf32>
    %cst_41 = arith.constant 1.000000e-24 : f32
    %80 = vector.broadcast %cst_41 : f32 to vector<2x128xf32>
    %81 = arith.maximumf %79, %80 : vector<2x128xf32>
    %82 = math.rsqrt %81 : vector<2x128xf32>
    %83 = arith.mulf %39, %82 : vector<2x128xf32>
    %84 = arith.mulf %41, %82 : vector<2x128xf32>
    %85 = arith.mulf %43, %82 : vector<2x128xf32>
    %86 = arith.mulf %45, %45 : vector<2x128xf32>
    %87 = arith.mulf %47, %47 : vector<2x128xf32>
    %88 = arith.addf %86, %87 : vector<2x128xf32>
    %89 = arith.mulf %49, %49 : vector<2x128xf32>
    %90 = arith.addf %88, %89 : vector<2x128xf32>
    %cst_42 = arith.constant 1.000000e-24 : f32
    %91 = vector.broadcast %cst_42 : f32 to vector<2x128xf32>
    %92 = arith.maximumf %90, %91 : vector<2x128xf32>
    %93 = math.rsqrt %92 : vector<2x128xf32>
    %94 = arith.mulf %45, %93 : vector<2x128xf32>
    %95 = arith.mulf %47, %93 : vector<2x128xf32>
    %96 = arith.mulf %49, %93 : vector<2x128xf32>
    %97 = arith.mulf %72, %83 : vector<2x128xf32>
    %98 = arith.mulf %73, %84 : vector<2x128xf32>
    %99 = arith.addf %97, %98 : vector<2x128xf32>
    %100 = arith.mulf %74, %85 : vector<2x128xf32>
    %101 = arith.addf %99, %100 : vector<2x128xf32>
    %cst_43 = arith.constant 0.000000e+00 : f32
    %102 = vector.broadcast %cst_43 : f32 to vector<2x128xf32>
    %103 = arith.cmpf ogt, %101, %102 : vector<2x128xf32>
    %104 = arith.andi %103, %56 : vector<2x128xi1>
    %cst_44 = arith.constant 0.000000e+00 : f32
    %105 = vector.broadcast %cst_44 : f32 to vector<2x128xf32>
    %106 = arith.select %104, %101, %105 : vector<2x128xi1>, vector<2x128xf32>
    %cst_45 = arith.constant 9.99999997E-7 : f32
    %107 = vector.broadcast %cst_45 : f32 to vector<2x128xf32>
    %108 = arith.maximumf %101, %107 : vector<2x128xf32>
    %109 = arith.addf %83, %94 : vector<2x128xf32>
    %110 = arith.addf %84, %95 : vector<2x128xf32>
    %111 = arith.addf %85, %96 : vector<2x128xf32>
    %112 = arith.mulf %109, %109 : vector<2x128xf32>
    %113 = arith.mulf %110, %110 : vector<2x128xf32>
    %114 = arith.addf %112, %113 : vector<2x128xf32>
    %115 = arith.mulf %111, %111 : vector<2x128xf32>
    %116 = arith.addf %114, %115 : vector<2x128xf32>
    %cst_46 = arith.constant 1.000000e-24 : f32
    %117 = vector.broadcast %cst_46 : f32 to vector<2x128xf32>
    %118 = arith.maximumf %116, %117 : vector<2x128xf32>
    %119 = math.rsqrt %118 : vector<2x128xf32>
    %120 = arith.mulf %109, %119 : vector<2x128xf32>
    %121 = arith.mulf %110, %119 : vector<2x128xf32>
    %122 = arith.mulf %111, %119 : vector<2x128xf32>
    %123 = arith.mulf %120, %72 : vector<2x128xf32>
    %124 = arith.mulf %121, %73 : vector<2x128xf32>
    %125 = arith.addf %123, %124 : vector<2x128xf32>
    %126 = arith.mulf %122, %74 : vector<2x128xf32>
    %127 = arith.addf %125, %126 : vector<2x128xf32>
    %cst_47 = arith.constant 9.99999997E-7 : f32
    %128 = vector.broadcast %cst_47 : f32 to vector<2x128xf32>
    %129 = arith.maximumf %127, %128 : vector<2x128xf32>
    %130 = arith.mulf %129, %129 : vector<2x128xf32>
    %131 = arith.mulf %83, %94 : vector<2x128xf32>
    %132 = arith.mulf %84, %95 : vector<2x128xf32>
    %133 = arith.addf %131, %132 : vector<2x128xf32>
    %134 = arith.mulf %85, %96 : vector<2x128xf32>
    %135 = arith.addf %133, %134 : vector<2x128xf32>
    %cst_48 = arith.constant 9.99999997E-7 : f32
    %136 = vector.broadcast %cst_48 : f32 to vector<2x128xf32>
    %137 = arith.maximumf %135, %136 : vector<2x128xf32>
    %138 = arith.mulf %120, %94 : vector<2x128xf32>
    %139 = arith.mulf %121, %95 : vector<2x128xf32>
    %140 = arith.addf %138, %139 : vector<2x128xf32>
    %141 = arith.mulf %122, %96 : vector<2x128xf32>
    %142 = arith.addf %140, %141 : vector<2x128xf32>
    %cst_49 = arith.constant 9.99999997E-7 : f32
    %143 = vector.broadcast %cst_49 : f32 to vector<2x128xf32>
    %144 = arith.maximumf %142, %143 : vector<2x128xf32>
    %145 = arith.minimumf %108, %137 : vector<2x128xf32>
    %cst_50 = arith.constant 2.000000e+00 : f32
    %146 = vector.broadcast %cst_50 : f32 to vector<2x128xf32>
    %147 = arith.mulf %146, %129 : vector<2x128xf32>
    %148 = arith.mulf %145, %147 : vector<2x128xf32>
    %cst_51 = arith.constant 1.000000e+00 : f32
    %149 = vector.broadcast %cst_51 : f32 to vector<2x128xf32>
    %150 = arith.divf %149, %144 : vector<2x128xf32>
    %151 = arith.mulf %148, %150 : vector<2x128xf32>
    %cst_52 = arith.constant 1.000000e+00 : f32
    %152 = vector.broadcast %cst_52 : f32 to vector<2x128xf32>
    %153 = arith.minimumf %151, %152 : vector<2x128xf32>
    %cst_53 = arith.constant 1.000000e+00 : f32
    %154 = vector.broadcast %cst_53 : f32 to vector<2x128xf32>
    %155 = arith.subf %154, %144 : vector<2x128xf32>
    %156 = arith.mulf %155, %155 : vector<2x128xf32>
    %157 = arith.mulf %156, %156 : vector<2x128xf32>
    %158 = arith.mulf %157, %155 : vector<2x128xf32>
    %159 = arith.mulf %108, %137 : vector<2x128xf32>
    %cst_54 = arith.constant 3.14159274 : f32
    %160 = vector.broadcast %cst_54 : f32 to vector<2x128xf32>
    %161 = arith.mulf %160, %159 : vector<2x128xf32>
    %cst_55 = arith.constant 1.000000e+00 : f32
    %162 = vector.broadcast %cst_55 : f32 to vector<2x128xf32>
    %163 = arith.divf %162, %161 : vector<2x128xf32>
    %164 = arith.mulf %153, %163 : vector<2x128xf32>
    %cst_56 = arith.constant 0.000000e+00 : f32
    %165 = vector.broadcast %cst_56 : f32 to vector<2x128xf32>
    %c0_57 = arith.constant 0 : index
    %c10 = arith.constant 10 : index
    %c0_58 = arith.constant 0 : index
    %c0_59 = arith.constant 0 : index
    %166 = vector.load %arg3[%c0_57, %c10, %c0_58, %c0_59] : memref<1x16x2x128xf32, #tpu.memory_space<vmem>>, vector<1x1x2x128xf32>
    %167 = vector.shape_cast %166 : vector<1x1x2x128xf32> to vector<2x128xf32>
    %c0_60 = arith.constant 0 : index
    %c12 = arith.constant 12 : index
    %c0_61 = arith.constant 0 : index
    %c0_62 = arith.constant 0 : index
    %168 = vector.load %arg3[%c0_60, %c12, %c0_61, %c0_62] : memref<1x16x2x128xf32, #tpu.memory_space<vmem>>, vector<1x1x2x128xf32>
    %169 = vector.shape_cast %168 : vector<1x1x2x128xf32> to vector<2x128xf32>
    %c0_63 = arith.constant 0 : index
    %c14 = arith.constant 14 : index
    %c0_64 = arith.constant 0 : index
    %c0_65 = arith.constant 0 : index
    %170 = vector.load %arg3[%c0_63, %c14, %c0_64, %c0_65] : memref<1x16x2x128xf32, #tpu.memory_space<vmem>>, vector<1x1x2x128xf32>
    %171 = vector.shape_cast %170 : vector<1x1x2x128xf32> to vector<2x128xf32>
    %172 = arith.mulf %167, %167 : vector<2x128xf32>
    %cst_66 = arith.constant 1.000000e+00 : f32
    %173 = vector.broadcast %cst_66 : f32 to vector<2x128xf32>
    %174 = arith.subf %172, %173 : vector<2x128xf32>
    %175 = arith.mulf %130, %174 : vector<2x128xf32>
    %cst_67 = arith.constant 1.000000e+00 : f32
    %176 = vector.broadcast %cst_67 : f32 to vector<2x128xf32>
    %177 = arith.addf %175, %176 : vector<2x128xf32>
    %cst_68 = arith.constant 0.318309873 : f32
    %178 = vector.broadcast %cst_68 : f32 to vector<2x128xf32>
    %179 = arith.mulf %172, %178 : vector<2x128xf32>
    %180 = arith.mulf %177, %177 : vector<2x128xf32>
    %cst_69 = arith.constant 1.000000e+00 : f32
    %181 = vector.broadcast %cst_69 : f32 to vector<2x128xf32>
    %182 = arith.divf %181, %180 : vector<2x128xf32>
    %183 = arith.mulf %179, %182 : vector<2x128xf32>
    %cst_70 = arith.constant 1.000000e+00 : f32
    %184 = vector.broadcast %cst_70 : f32 to vector<2x128xf32>
    %185 = arith.subf %184, %171 : vector<2x128xf32>
    %186 = arith.mulf %185, %158 : vector<2x128xf32>
    %187 = arith.addf %171, %186 : vector<2x128xf32>
    %188 = arith.mulf %183, %187 : vector<2x128xf32>
    %189 = arith.mulf %164, %169 : vector<2x128xf32>
    %190 = arith.mulf %188, %189 : vector<2x128xf32>
    %191 = arith.addf %165, %190 : vector<2x128xf32>
    %c0_71 = arith.constant 0 : index
    %c11 = arith.constant 11 : index
    %c0_72 = arith.constant 0 : index
    %c0_73 = arith.constant 0 : index
    %192 = vector.load %arg3[%c0_71, %c11, %c0_72, %c0_73] : memref<1x16x2x128xf32, #tpu.memory_space<vmem>>, vector<1x1x2x128xf32>
    %193 = vector.shape_cast %192 : vector<1x1x2x128xf32> to vector<2x128xf32>
    %c0_74 = arith.constant 0 : index
    %c13 = arith.constant 13 : index
    %c0_75 = arith.constant 0 : index
    %c0_76 = arith.constant 0 : index
    %194 = vector.load %arg3[%c0_74, %c13, %c0_75, %c0_76] : memref<1x16x2x128xf32, #tpu.memory_space<vmem>>, vector<1x1x2x128xf32>
    %195 = vector.shape_cast %194 : vector<1x1x2x128xf32> to vector<2x128xf32>
    %c0_77 = arith.constant 0 : index
    %c15 = arith.constant 15 : index
    %c0_78 = arith.constant 0 : index
    %c0_79 = arith.constant 0 : index
    %196 = vector.load %arg3[%c0_77, %c15, %c0_78, %c0_79] : memref<1x16x2x128xf32, #tpu.memory_space<vmem>>, vector<1x1x2x128xf32>
    %197 = vector.shape_cast %196 : vector<1x1x2x128xf32> to vector<2x128xf32>
    %198 = arith.mulf %193, %193 : vector<2x128xf32>
    %cst_80 = arith.constant 1.000000e+00 : f32
    %199 = vector.broadcast %cst_80 : f32 to vector<2x128xf32>
    %200 = arith.subf %198, %199 : vector<2x128xf32>
    %201 = arith.mulf %130, %200 : vector<2x128xf32>
    %cst_81 = arith.constant 1.000000e+00 : f32
    %202 = vector.broadcast %cst_81 : f32 to vector<2x128xf32>
    %203 = arith.addf %201, %202 : vector<2x128xf32>
    %cst_82 = arith.constant 0.318309873 : f32
    %204 = vector.broadcast %cst_82 : f32 to vector<2x128xf32>
    %205 = arith.mulf %198, %204 : vector<2x128xf32>
    %206 = arith.mulf %203, %203 : vector<2x128xf32>
    %cst_83 = arith.constant 1.000000e+00 : f32
    %207 = vector.broadcast %cst_83 : f32 to vector<2x128xf32>
    %208 = arith.divf %207, %206 : vector<2x128xf32>
    %209 = arith.mulf %205, %208 : vector<2x128xf32>
    %cst_84 = arith.constant 1.000000e+00 : f32
    %210 = vector.broadcast %cst_84 : f32 to vector<2x128xf32>
    %211 = arith.subf %210, %197 : vector<2x128xf32>
    %212 = arith.mulf %211, %158 : vector<2x128xf32>
    %213 = arith.addf %197, %212 : vector<2x128xf32>
    %214 = arith.mulf %209, %213 : vector<2x128xf32>
    %215 = arith.mulf %164, %195 : vector<2x128xf32>
    %216 = arith.mulf %214, %215 : vector<2x128xf32>
    %217 = arith.addf %191, %216 : vector<2x128xf32>
    %cst_85 = arith.constant 1.000000e+00 : f32
    %218 = vector.broadcast %cst_85 : f32 to vector<2x128xf32>
    %219 = arith.divf %218, %63 : vector<2x128xf32>
    %220 = arith.mulf %106, %219 : vector<2x128xf32>
    %221 = arith.addf %33, %217 : vector<2x128xf32>
    %222 = vector.broadcast %13 : f32 to vector<2x128xf32>
    %223 = arith.mulf %220, %222 : vector<2x128xf32>
    %224 = arith.mulf %221, %223 : vector<2x128xf32>
    %225 = arith.addf %35, %217 : vector<2x128xf32>
    %226 = vector.broadcast %15 : f32 to vector<2x128xf32>
    %227 = arith.mulf %220, %226 : vector<2x128xf32>
    %228 = arith.mulf %225, %227 : vector<2x128xf32>
    %229 = arith.addf %37, %217 : vector<2x128xf32>
    %230 = vector.broadcast %17 : f32 to vector<2x128xf32>
    %231 = arith.mulf %220, %230 : vector<2x128xf32>
    %232 = arith.mulf %229, %231 : vector<2x128xf32>
    %cst_86 = arith.constant 0.000000e+00 : f32
    %233 = vector.broadcast %cst_86 : f32 to vector<2x128xf32>
    %234 = arith.cmpf ogt, %19, %233 : vector<2x128xf32>
    %cst_87 = arith.constant 1.000000e+00 : f32
    %235 = vector.broadcast %cst_87 : f32 to vector<2x128xf32>
    %236 = arith.select %234, %224, %235 : vector<2x128xi1>, vector<2x128xf32>
    %c0_88 = arith.constant 0 : index
    %c0_89 = arith.constant 0 : index
    %c0_90 = arith.constant 0 : index
    %c0_91 = arith.constant 0 : index
    %237 = vector.load %arg4[%c0_88, %c0_89, %c0_90, %c0_91] : memref<1x4x2x128xf32, #tpu.memory_space<vmem>>, vector<1x1x2x128xf32>
    %238 = vector.shape_cast %237 : vector<1x1x2x128xf32> to vector<2x128xf32>
    %239 = vector.shape_cast %236 : vector<2x128xf32> to vector<1x1x2x128xf32>
    tpu.vector_store %arg4[%c0_88, %c0_89, %c0_90, %c0_91], %239 {strides = array<i32>} : memref<1x4x2x128xf32, #tpu.memory_space<vmem>>, vector<1x1x2x128xf32>,
    %cst_92 = arith.constant 1.000000e+00 : f32
    %240 = vector.broadcast %cst_92 : f32 to vector<2x128xf32>
    %241 = arith.select %234, %228, %240 : vector<2x128xi1>, vector<2x128xf32>
    %c0_93 = arith.constant 0 : index
    %c1_94 = arith.constant 1 : index
    %c0_95 = arith.constant 0 : index
    %c0_96 = arith.constant 0 : index
    %242 = vector.load %arg4[%c0_93, %c1_94, %c0_95, %c0_96] : memref<1x4x2x128xf32, #tpu.memory_space<vmem>>, vector<1x1x2x128xf32>
    %243 = vector.shape_cast %242 : vector<1x1x2x128xf32> to vector<2x128xf32>
    %244 = vector.shape_cast %241 : vector<2x128xf32> to vector<1x1x2x128xf32>
    tpu.vector_store %arg4[%c0_93, %c1_94, %c0_95, %c0_96], %244 {strides = array<i32>} : memref<1x4x2x128xf32, #tpu.memory_space<vmem>>, vector<1x1x2x128xf32>,
    %cst_97 = arith.constant 1.000000e+00 : f32
    %245 = vector.broadcast %cst_97 : f32 to vector<2x128xf32>
    %246 = arith.select %234, %232, %245 : vector<2x128xi1>, vector<2x128xf32>
    %c0_98 = arith.constant 0 : index
    %c2_99 = arith.constant 2 : index
    %c0_100 = arith.constant 0 : index
    %c0_101 = arith.constant 0 : index
    %247 = vector.load %arg4[%c0_98, %c2_99, %c0_100, %c0_101] : memref<1x4x2x128xf32, #tpu.memory_space<vmem>>, vector<1x1x2x128xf32>
    %248 = vector.shape_cast %247 : vector<1x1x2x128xf32> to vector<2x128xf32>
    %249 = vector.shape_cast %246 : vector<2x128xf32> to vector<1x1x2x128xf32>
    tpu.vector_store %arg4[%c0_98, %c2_99, %c0_100, %c0_101], %249 {strides = array<i32>} : memref<1x4x2x128xf32, #tpu.memory_space<vmem>>, vector<1x1x2x128xf32>,
    %c0_102 = arith.constant 0 : index
    %c3_103 = arith.constant 3 : index
    %c0_104 = arith.constant 0 : index
    %c0_105 = arith.constant 0 : index
    %250 = vector.load %arg4[%c0_102, %c3_103, %c0_104, %c0_105] : memref<1x4x2x128xf32, #tpu.memory_space<vmem>>, vector<1x1x2x128xf32>
    %251 = vector.shape_cast %250 : vector<1x1x2x128xf32> to vector<2x128xf32>
    %252 = vector.shape_cast %19 : vector<2x128xf32> to vector<1x1x2x128xf32>
    tpu.vector_store %arg4[%c0_102, %c3_103, %c0_104, %c0_105], %252 {strides = array<i32>} : memref<1x4x2x128xf32, #tpu.memory_space<vmem>>, vector<1x1x2x128xf32>,
    return
  }
  func.func @transform_0(%arg0: i32, %arg1: i32) -> (i32, i32) {
    %c0_i32 = arith.constant 0 : i32
    %c0_i32_0 = arith.constant 0 : i32
    %c0_i32_1 = arith.constant 0 : i32
    return %c0_i32, %c0_i32_0 : i32, i32
  }
  func.func @transform_1(%arg0: i32, %arg1: i32) -> (i32, i32, i32, i32) {
    %c0_i32 = arith.constant 0 : i32
    %c0_i32_0 = arith.constant 0 : i32
    %c0_i32_1 = arith.constant 0 : i32
    return %arg0, %c0_i32, %arg1, %c0_i32_0 : i32, i32, i32, i32
  }
  func.func @transform_2(%arg0: i32, %arg1: i32) -> (i32, i32, i32, i32) {
    %c0_i32 = arith.constant 0 : i32
    %c0_i32_0 = arith.constant 0 : i32
    %c0_i32_1 = arith.constant 0 : i32
    return %arg0, %c0_i32, %arg1, %c0_i32_0 : i32, i32, i32, i32
  }
}

</mosaic_0001>

<bundles_post_ra>
// kernel: tpu_custom_call.1
= control target key start
LH: loop header
LB: loop body
LE: loop exit
PB: predicated region body
PF: predicated region fallthrough
CT: control target
= control target key end

     0   :  { %7 = vsyncpa [#allocation5], 0  ;;  %s1056_s0 = inlined_call_operand.hbm [shape: f32[2,9], index: 0, kind: input, shape index: {}]   ;;  %s1057_s1 = inlined_call_operand.hbm [shape: f32[2,16,2,128], index: 1, kind: input, shape index: {}]   ;;  %s1058_s2 = inlined_call_operand.hbm [shape: f32[2,4,2,128], index: 2, kind: output, shape index: {}]  }
   0x1   :  { %8 = vsyncpa [#allocation3], 0 }
   0x2   :  { %10 = vsyncpa [#allocation3 + $0x1], 0 }
   0x3   :  { %11 = vsyncpa [#allocation4], 0 }
   0x4   :  { %13 = vsyncpa [#allocation4 + $0x1], 0  ;;  %s804_s9 = smov 0   ;;  %s806_s10 = smov 0  }
   0x5   :  { %s808_s11 = smov 0   ;;  %s810_s12 = smov 0  }
   0x6   :  { %s812_s13 = smov 0   ;;  %s814_s14 = smov 0  }
   0x7 LB: > { %s516_s15 = sadd.s32 4294967295, %s780_s14   ;;  %s517_s16 = sadd.s32 4294967294, %s780_s14   ;;  %s780_s14 = sphi %s814_s14, %s19_s14   ;;  %s776_s13 = sphi %s812_s13, %s1078_s13   ;;  %s772_s12 = sphi %s810_s12, %s1077_s12   ;;  %s768_s11 = sphi %s808_s11, %s1076_s11   ;;  %s764_s10 = sphi %s806_s10, %s1075_s10   ;;  %s760_s9 = sphi %s804_s9, %s1074_s9  }
   0x8   : > { %s61_s17 = sadd.s32 1, %s768_s11  ;;  %p68_p0 = scmp.ne.s32.totalorder %s768_s11, %s764_s10 }
   0x9   : > { %p69_p1 = scmp.eq.s32.totalorder %s780_s14, 0  ;;  %p74_p2 = scmp.ne.s32.totalorder %s764_s10, %s760_s9 }
   0xa   : > { %p842_p3 = scmp.eq.s32.totalorder %s516_s15, 0  ;;  %p100_p4 = scmp.eq.s32.totalorder %s516_s15, 1 }
   0xb   : > { %p70_p5 = por %p69_p1, %p68_p0  ;;  %p106_p6 = scmp.eq.s32.totalorder %s517_s16, 1 }
   0xc   : > { %s1063_s18 = scalar_select %p842_p3, 1, 0 }
   0xd   : > { %p848_p7 = por %p842_p3, %p74_p2  ;;  %p852_p8 = por %p100_p4, %p68_p0 }
   0xe   : > { %p856_p9 = por %p106_p6, %p74_p2  ;;  %p518_p10 = scmp.ge.s32.totalorder %s780_s14, 1 }
   0xf   : > { %s1064_s19 = scalar_select %p848_p7, 1, 0 }
  0x10   : > { %s1065_s20 = scalar_select %p852_p8, 1, 0 }
  0x11   : > { %s1066_s21 = scalar_select %p856_p9, 1, 0 }
  0x12   : > { %p113_p11 = scmp.lt.s32.totalorder %s780_s14, 3  ;;  %p577_p1 = scmp.lt.s32.totalorder %s780_s14, 2 }
  0x13   : > { %s135_s23 = sand.u32 1, %s768_s11   ;;  %s31_s25 = sadd.s32 1, %s776_s13 }
  0x14   : > { %p863_p13 = pnand %p518_p10, %p113_p11  ;;  %p871_p0 = pnand %p577_p1, %p70_p5 }
  0x15   : > { %s521_s26 = sshll.u32 %s135_s23, 5  ;;  %p33_p4 = scmp.ge.s32.totalorder %s31_s25, 2 }
  0x16   : > { %p564_p7 = pneg %p863_p13  ;;  %s651_s29 = scalar_lea.hbm %s1056_s0, 32 }
  0x17   : > { %p652_p6 = scmp.ne.s32.totalorder %s1056_s0, %s651_s29  ;;  %p658_p5 = scmp.lt.u32.totalorder %s651_s29, %s1056_s0 }
  0x18   : > { %p565_p2 = pnand %p564_p7, %p842_p3 }
  0x1a   : > { %p653_p10 = pneg %p565_p2 }
  0x1c   : > { %p654_p11 = pnand %p653_p10, %p652_p6 }
  0x1e   : > { %p655_p12 = pneg %p654_p11 }
  0x20   : > { %p660_p1 = pnand %p658_p5, %p655_p12 }
  0x22   : > { %663 = shalt.err (!%p660_p1)
}
  0x23   : > { %s782_s6 = smov [#allocation2]   ;;  %s1080_s25 = smov (%p33_p4, %s31_s25), 0 }
  0x24   : > { %567 = dma.hbm_to_smem (!%p565_p2), %s1056_s0, 32, %s782_s6, [#allocation5]  }
  0x25   : > { %s554_s15 = sshll.u32 %s776_s13, 9  ;;  %s56_s16 = ssub.s32 %s776_s13, %s1080_s25 }
  0x26   : > { %s898_s29 = scalar_lea.hbm %s1057_s1, %s554_s15  ;;  %p59_p7 = scmp.eq.s32.totalorder %s56_s16, 0 }
  0x27   : > { %s139_s30 = scalar_lea.vmem [#allocation6], %s521_s26  ;;  %s907_s5 = scalar_lea.sflag [#allocation3], %s135_s23 }
  0x28   : > { %s147_s3 = sshll.u32 %s139_s30, 4  ;;  %s664_s6 = scalar_lea.hbm %s898_s29, 512  ;;  %s900_s3 = int_to_ptr.vmem [resolvable:$true] %s147_s3 }
  0x29   : > { %s905_s4 = scalar_select %p59_p7, %s768_s11, %s61_s17  }
  0x2a   : > { %p665_p12 = scmp.ne.s32.totalorder %s898_s29, %s664_s6  ;;  %p666_p2 = pneg %p871_p0 }
  0x2b   : > { %s669_s26 = scalar_lea.hbm %s1057_s1, 1024  ;;  %p670_p10 = scmp.lt.u32.totalorder %s898_s29, %s1057_s1 }
  0x2c   : > { %p667_p4 = pnand %p666_p2, %p665_p12  ;;  %p671_p11 = scmp.lt.u32.totalorder %s669_s26, %s664_s6 }
  0x2d   : > { %p673_p1 = scmp.lt.u32.totalorder %s664_s6, %s898_s29 }
  0x2e   : > { %p668_p6 = pneg %p667_p4  ;;  %p672_p5 = por %p671_p11, %p670_p10 }
  0x30   : > { %p674_p7 = por %p673_p1, %p672_p5 }
  0x32   : > { %p675_p9 = pnand %p674_p7, %p668_p6 }
  0x34   : > { %678 = shalt.err (!%p675_p9)
}
  0x35   : > { %s679_s17 = scalar_lea.vmem %s900_s3, 512  ;;  %s783_s23 = smov [#allocation6]  }
  0x36   : > { %p680_p12 = scmp.ne.s32.totalorder %s900_s3, %s679_s17  ;;  %s684_s27 = sshll.u32 %s783_s23, 4  ;;  %s685_s27 = int_to_ptr.vmem [resolvable:$false] %s684_s27 }
  0x37   : > { %s686_s28 = scalar_lea.vmem %s685_s27, 1024  ;;  %p687_p3 = scmp.lt.s32.totalorder %s900_s3, %s685_s27 }
  0x38   : > { %p682_p4 = pnand %p680_p12, %p666_p2  ;;  %p688_p10 = scmp.lt.s32.totalorder %s686_s28, %s679_s17 }
  0x3a   : > { %p683_p8 = pneg %p682_p4  ;;  %p689_p11 = por %p688_p10, %p687_p3 }
  0x3c   : > { %p690_p5 = pnand %p689_p11, %p683_p8 }
  0x3e   : > { %693 = shalt.err (!%p690_p5)
}
  0x3f   : > { %s784_s30 = smov 32   ;;  %s785_s6 = smov 2  }
  0x40   : > { %571 = dma.hbm_to_vmem [thread:$0]  (!%p871_p0), %s898_s29, 512, %s900_s3, %s907_s5, %s784_s30, %s784_s30, %s785_s6  }
  0x41   : > { %159 = sbr.rel (%p863_p13) target bundleno = 195 (0xc3), region = 28  ;;  %p1069_p9 = scmp.ne.s32.totalorder (!%p863_p13), %s1063_s18, 0 }
  0x48   : > { %747 = dma.done.wait (%p1069_p9), [#allocation5], 32  }
  0x49   : > { %749 = vsyncadd (%p1069_p9), [#allocation5], 4294967264  ;;  %s942_s7 = sand.u32 1, %s764_s10   ;;  %p1070_p3 = scmp.ne.s32.totalorder %s1064_s19, 0 }
  0x4a   : > { %s526_s8 = sshll.u32 %s942_s7, 5  ;;  %s166_s26 = scalar_lea.sflag [#allocation3], %s942_s7 }
  0x4b   : > { %s946_s15 = scalar_lea.vmem [#allocation6], %s526_s8 }
  0x4c   : > { %751 = dma.done.wait (%p1070_p3), %s166_s26, 512  }
  0x4d   : > { %753 = vsyncadd (%p1070_p3), %s166_s26, 4294966784 }
  0x4e   : > { %174 = sfence }
  0x4f   : > { %s527_s18 = sshll.u32 %s942_s7, 3  ;;  %s954_s22 = sshll.u32 %s772_s12, 7  ;;  %v958_v0 = vld [vmem:[%s946_s15] sm:$0x3]  ;;  %v532_v1 = vld [vmem:[%s946_s15 + $0x8] sm:$0x3] }
  0x50   : > { %s192_s24 = sld [smem:[#allocation2 + %s954_s22]]  ;;  %s193_s19 = sadd.s32 1, %s954_s22  ;;  %v533_v2 = vld [vmem:[%s946_s15 + $0xa] sm:$0x3]  ;;  %v534_v3 = vld [vmem:[%s946_s15 + $0xc] sm:$0x3]  ;;  %v252_v4 = vmul.f32 %v532_v1, %v532_v1 }
  0x51   : > { %s195_s29 = sadd.s32 2, %s954_s22  ;;  %s964_s3 = scalar_lea.vmem [#allocation7], %s527_s18  ;;  %v253_v5 = vmul.f32 %v533_v2, %v533_v2  ;;  %v529_v6 = vld [vmem:[%s946_s15 + $0x2] sm:$0x3]  ;;  %v255_v8 = vmul.f32 %v534_v3, %v534_v3  ;;  %v530_v9 = vld [vmem:[%s946_s15 + $0x4] sm:$0x3] }
  0x52   : > { %548 = vst [vmem:[%s964_s3 + $0x6] sm:$0x3] %v958_v0  ;;  %s194_s12 = sld [smem:[#allocation2 + %s193_s19]]  ;;  %s197_s16 = sadd.s32 3, %s954_s22  ;;  %v531_v10 = vld [vmem:[%s946_s15 + $0x6] sm:$0x3] }
  0x53   : > { %s196_s5 = sld [smem:[#allocation2 + %s195_s29]]  ;;  %s199_s17 = sadd.s32 4, %s954_s22  ;;  %v254_v7 = vadd.f32 %v253_v5, %v252_v4  ;;  %vm393_vm3 = vcmp.gt.f32.partialorder %v958_v0, 0.0 }
  0x54   : > { %s198_s23 = sld [smem:[#allocation2 + %s197_s16]]  ;;  %s201_s28 = sadd.s32 5, %s954_s22 }
  0x55   : > { %s200_s27 = sld [smem:[#allocation2 + %s199_s17]]  ;;  %v256_v15 = vadd.f32 %v255_v8, %v254_v7  ;;  %s203_s6 = sadd.s32 6, %s954_s22 }
  0x56   : > { %s202_s30 = sld [smem:[#allocation2 + %s201_s28]]  ;;  %v228_v11 = vstv %s192_s24  ;;  %s205_s8 = sadd.s32 7, %s954_s22 }
  0x57   : > { %v229_v12 = vsub.f32 %v228_v11, %v529_v6  ;;  %v257_v26 = vmax.f32 %v256_v15, 1e-24  ;;  %s207_s26 = sadd.s32 8, %s954_s22  ;;  %s204_s18 = sld [smem:[#allocation2 + %s203_s6]] }
  0x58   : > { %v230_v13 = vstv %s194_s12  ;;  %s206_s24 = sld [smem:[#allocation2 + %s205_s8]]  ;;  %s419_s29 = sshll.u32 %s964_s3, 4  ;;  %s1002_s29 = int_to_ptr.vmem [resolvable:$true] %s419_s29 }
  0x59   : > { %v232_v14 = vstv %s196_s5  ;;  %v231_v16 = vsub.f32 %v230_v13, %v530_v9  ;;  %v246_v18 = vmul.f32 %v229_v12, %v229_v12  ;;  %633 = vrsqrt.f32 %v257_v26  ;;  %s208_s19 = sld [smem:[#allocation2 + %s207_s26]]  ;;  %s999_s16 = scalar_lea.hbm %s1058_s2, %s954_s22 }
  0x5a   : > { %v233_v17 = vsub.f32 %v232_v14, %v531_v10  ;;  %v234_v19 = vstv %s198_s23  ;;  %s694_s22 = scalar_lea.vmem %s1002_s29, 128  ;;  %p1071_p13 = scmp.ne.s32.totalorder %s1065_s20, 0 }
  0x5b   : > { %v236_v20 = vstv %s200_s27  ;;  %v235_v21 = vsub.f32 %v234_v19, %v529_v6  ;;  %v247_v23 = vmul.f32 %v231_v16, %v231_v16  ;;  %p695_p8 = scmp.ne.s32.totalorder %s1002_s29, %s694_s22  ;;  %s786_s17 = smov [#allocation7]  }
  0x5c   : > { %v237_v22 = vsub.f32 %v236_v20, %v530_v9  ;;  %v249_v24 = vmul.f32 %v233_v17, %v233_v17  ;;  %v238_v25 = vstv %s202_s30  ;;  %s698_s23 = sshll.u32 %s786_s17, 4  ;;  %s699_s23 = int_to_ptr.vmem [resolvable:$false] %s698_s23 }
  0x5d   : > { %v239_v27 = vsub.f32 %v238_v25, %v531_v10  ;;  %v240_v28 = vmul.f32 %v532_v1, %v235_v21  ;;  %v248_v30 = vadd.f32 %v247_v23, %v246_v18  ;;  %v267_v31 = vmul.f32 %v235_v21, %v235_v21  ;;  %p696_p0 = pnand %p695_p8, %p1071_p13  ;;  %s700_s27 = scalar_lea.vmem %s699_s23, 256 }
  0x5e   : > { %v241_v29 = vmul.f32 %v533_v2, %v237_v22  ;;  %v268_v32 = vmul.f32 %v237_v22, %v237_v22  ;;  %v382_v6 = vstv %s204_s18  ;;  %v386_v7 = vstv %s206_s24  ;;  %p701_p6 = scmp.lt.s32.totalorder %s1002_s29, %s699_s23  ;;  %p702_p1 = scmp.lt.s32.totalorder %s700_s27, %s694_s22 }
  0x5f   : > { %v243_v34 = vmul.f32 %v534_v3, %v239_v27  ;;  %v250_v35 = vadd.f32 %v249_v24, %v248_v30  ;;  %v270_v36 = vmul.f32 %v239_v27, %v239_v27  ;;  %v390_v8 = vstv %s208_s19  ;;  %v538_v24 = vld [vmem:[%s946_s15 + $0x14] sm:$0x3]  ;;  %p697_p2 = pneg %p696_p0 }
  0x60   : > { %v242_v33 = vadd.f32 %v241_v29, %v240_v28  ;;  %v269_v37 = vadd.f32 %v268_v32, %v267_v31  ;;  %p703_p7 = por %p702_p1, %p701_p6 }
  0x61   : > { %v262_v39 = vmax.f32 %v250_v35, 1e-24  ;;  %v251_v42 = vmax.f32 %v250_v35, 1e-12  ;;  %v340_v35 = vmul.f32 %v538_v24, %v538_v24 }
  0x62   : > { %v244_v38 = vadd.f32 %v243_v34, %v242_v33  ;;  %v271_v40 = vadd.f32 %v270_v36, %v269_v37  ;;  %p704_p12 = pnand %p703_p7, %p697_p2 }
  0x63   : > { %635 = vrsqrt.f32 %v262_v39  ;;  %v634_v43 = vpop.eup %633 }
  0x64   : > { %v272_v41 = vmax.f32 %v271_v40, 1e-24  ;;  %v259_v45 = vmul.f32 %v634_v43, %v532_v1  ;;  %v260_v46 = vmul.f32 %v634_v43, %v533_v2  ;;  %v261_v47 = vmul.f32 %v634_v43, %v534_v3 }
  0x65   : > { %vm245_vm0 = vcmp.gt.f32.partialorder %v244_v38, 1e-12 }
  0x66   : > { %637 = vrsqrt.f32 %v272_v41 }
  0x67   : > { %639 = vrcp.f32 %v251_v42  ;;  %v541_v42 = vadd.f32 -1.0, %v340_v35 }
  0x6d   : > { %v636_v44 = vpop.eup %635 }
  0x6e   : > { %v264_v48 = vmul.f32 %v636_v44, %v229_v12  ;;  %v265_v49 = vmul.f32 %v636_v44, %v231_v16  ;;  %v266_v50 = vmul.f32 %v636_v44, %v233_v17 }
  0x70   : > { %v638_v51 = vpop.eup %637  ;;  %v277_v52 = vmul.f32 %v264_v48, %v259_v45  ;;  %v278_v53 = vmul.f32 %v265_v49, %v260_v46  ;;  %v280_v54 = vmul.f32 %v266_v50, %v261_v47 }
  0x71   : > { %v274_v55 = vmul.f32 %v638_v51, %v235_v21  ;;  %v275_v56 = vmul.f32 %v638_v51, %v237_v22  ;;  %v276_v57 = vmul.f32 %v638_v51, %v239_v27  ;;  %v640_v3 = vpop.eup %639  ;;  %v542_v27 = vld [vmem:[%s946_s15 + $0x16] sm:$0x3] }
  0x72   : > { %v279_v58 = vadd.f32 %v278_v53, %v277_v52  ;;  %v362_v36 = vmul.f32 %v542_v27, %v542_v27  ;;  %v535_v27 = vld [vmem:[%s946_s15 + $0xe] sm:$0x3] }
  0x73   : > { %v286_v59 = vadd.f32 %v274_v55, %v264_v48  ;;  %v287_v60 = vadd.f32 %v275_v56, %v265_v49  ;;  %v288_v61 = vadd.f32 %v276_v57, %v266_v50  ;;  %v306_v15 = vmul.f32 %v274_v55, %v264_v48 }
  0x74   : > { %v281_v62 = vadd.f32 %v280_v54, %v279_v58  ;;  %v307_v16 = vmul.f32 %v275_v56, %v265_v49  ;;  %v309_v18 = vmul.f32 %v276_v57, %v266_v50  ;;  %v545_v43 = vadd.f32 -1.0, %v362_v36 }
  0x75   : > { %v289_v63 = vmul.f32 %v286_v59, %v286_v59  ;;  %v290_v1 = vmul.f32 %v287_v60, %v287_v60  ;;  %v292_v2 = vmul.f32 %v288_v61, %v288_v61 }
  0x76   : > { %vm282_vm1 = vcmp.gt.f32.partialorder %v281_v62, 0.0  ;;  %v308_v17 = vadd.f32 %v307_v16, %v306_v15  ;;  %v285_v25 = vmax.f32 %v281_v62, 1e-06  ;;  %v543_v15 = vld [vmem:[%s946_s15 + $0x1a] sm:$0x3] }
  0x77   : > { %vm283_vm2 = vmand %vm282_vm1, %vm245_vm0  ;;  %v291_v4 = vadd.f32 %v290_v1, %v289_v63 }
  0x78   : > { %v284_v5 = vsel %vm283_vm2, %v281_v62, 0.0  ;;  %v310_v19 = vadd.f32 %v309_v18, %v308_v17 }
  0x79   : > { %v293_v9 = vadd.f32 %v292_v2, %v291_v4  ;;  %v380_v10 = vmul.f32 %v640_v3, %v284_v5 }
  0x7a   : > { %v311_v26 = vmax.f32 %v310_v19, 1e-06 }
  0x7b   : > { %v294_v11 = vmax.f32 %v293_v9, 1e-24  ;;  %v978_v12 = vmul.f32 %v382_v6, %v380_v10  ;;  %v980_v13 = vmul.f32 %v386_v7, %v380_v10  ;;  %v982_v14 = vmul.f32 %v390_v8, %v380_v10  ;;  %v539_v9 = vld [vmem:[%s946_s15 + $0x18] sm:$0x3] }
  0x7c   : > { %v329_v38 = vmul.f32 %v311_v26, %v285_v25  ;;  %v318_v51 = vmin.f32 %v285_v25, %v311_v26  ;;  %v344_v7 = vmul.f32 0.31830987, %v340_v35  ;;  %v366_v10 = vmul.f32 0.31830987, %v362_v36 }
  0x7d   : > { %641 = vrsqrt.f32 %v294_v11 }
  0x7e   : > { %v330_v48 = vmul.f32 3.1415927, %v329_v38 }
  0x87   : > { %v642_v20 = vpop.eup %641 }
  0x88   : > { %v296_v21 = vmul.f32 %v642_v20, %v286_v59  ;;  %v297_v22 = vmul.f32 %v642_v20, %v287_v60  ;;  %v298_v23 = vmul.f32 %v642_v20, %v288_v61  ;;  %v544_v59 = vld [vmem:[%s946_s15 + $0x1e] sm:$0x3] }
  0x89   : > { %v371_v63 = vsub.f32 1.0, %v544_v59 }
  0x8a   : > { %v299_v28 = vmul.f32 %v296_v21, %v259_v45  ;;  %v300_v29 = vmul.f32 %v297_v22, %v260_v46  ;;  %v302_v30 = vmul.f32 %v298_v23, %v261_v47  ;;  %v312_v31 = vmul.f32 %v296_v21, %v274_v55 }
  0x8b   : > { %v313_v32 = vmul.f32 %v297_v22, %v275_v56  ;;  %v315_v33 = vmul.f32 %v298_v23, %v276_v57  ;;  %v540_v56 = vld [vmem:[%s946_s15 + $0x1c] sm:$0x3] }
  0x8c   : > { %v301_v34 = vadd.f32 %v300_v29, %v299_v28  ;;  %v349_v62 = vsub.f32 1.0, %v540_v56  ;;  %v536_v28 = vld [vmem:[%s946_s15 + $0x10] sm:$0x3]  ;;  %v537_v29 = vld [vmem:[%s946_s15 + $0x12] sm:$0x3]  ;;  %s405_s15 = scalar_lea.sflag [#allocation4], %s942_s7 }
  0x8d   : > { %v314_v37 = vadd.f32 %v313_v32, %v312_v31 }
  0x8e   : > { %v303_v39 = vadd.f32 %v302_v30, %v301_v34 }
  0x8f   : > { %v316_v40 = vadd.f32 %v315_v33, %v314_v37 }
  0x90   : > { %v304_v41 = vmax.f32 %v303_v39, 1e-06 }
  0x91   : > { %v317_v44 = vmax.f32 %v316_v40, 1e-06 }
  0x92   : > { %v305_v45 = vmul.f32 %v304_v41, %v304_v41  ;;  %v319_v52 = vmul.f32 2.0, %v304_v41 }
  0x93   : > { %643 = vrcp.f32 %v317_v44  ;;  %v325_v46 = vsub.f32 1.0, %v317_v44 }
  0x94   : > { %v342_v47 = vmul.f32 %v541_v42, %v305_v45  ;;  %v364_v49 = vmul.f32 %v545_v43, %v305_v45  ;;  %645 = vrcp.f32 %v330_v48  ;;  %v320_v60 = vmul.f32 %v319_v52, %v318_v51 }
  0x95   : > { %v326_v50 = vmul.f32 %v325_v46, %v325_v46 }
  0x96   : > { %v343_v53 = vadd.f32 1.0, %v342_v47  ;;  %v365_v54 = vadd.f32 1.0, %v364_v49 }
  0x97   : > { %v327_v55 = vmul.f32 %v326_v50, %v326_v50 }
  0x98   : > { %v345_v57 = vmul.f32 %v343_v53, %v343_v53  ;;  %v367_v58 = vmul.f32 %v365_v54, %v365_v54 }
  0x99   : > { %v328_v61 = vmul.f32 %v327_v55, %v325_v46 }
  0x9a   : > { %647 = vrcp.f32 %v345_v57 }
  0x9b   : > { %649 = vrcp.f32 %v367_v58  ;;  %v350_v4 = vmul.f32 %v349_v62, %v328_v61  ;;  %v372_v6 = vmul.f32 %v371_v63, %v328_v61 }
  0x9d   : > { %v644_v1 = vpop.eup %643  ;;  %v351_v11 = vadd.f32 %v540_v56, %v350_v4  ;;  %v373_v17 = vadd.f32 %v544_v59, %v372_v6 }
  0x9e   : > { %v323_v2 = vmul.f32 %v644_v1, %v320_v60  ;;  %v646_v3 = vpop.eup %645 }
  0xa0   : > { %v324_v5 = vmin.f32 %v323_v2, 1.0 }
  0xa2   : > { %v333_v8 = vmul.f32 %v646_v3, %v324_v5 }
  0xa4   : > { %v648_v16 = vpop.eup %647  ;;  %v353_v20 = vmul.f32 %v539_v9, %v333_v8  ;;  %v375_v22 = vmul.f32 %v543_v15, %v333_v8 }
  0xa5   : > { %v650_v18 = vpop.eup %649  ;;  %v348_v19 = vmul.f32 %v648_v16, %v344_v7 }
  0xa6   : > { %v370_v21 = vmul.f32 %v650_v18, %v366_v10 }
  0xa7   : > { %v352_v23 = vmul.f32 %v351_v11, %v348_v19 }
  0xa8   : > { %v374_v24 = vmul.f32 %v373_v17, %v370_v21 }
  0xa9   : > { %v354_v25 = vmul.f32 %v353_v20, %v352_v23 }
  0xaa   : > { %v376_v26 = vmul.f32 %v375_v22, %v374_v24 }
  0xac   : > { %v377_v30 = vadd.f32 %v376_v26, %v354_v25 }
  0xae   : > { %v381_v31 = vadd.f32 %v535_v27, %v377_v30  ;;  %v385_v32 = vadd.f32 %v536_v28, %v377_v30  ;;  %v389_v33 = vadd.f32 %v537_v29, %v377_v30 }
  0xb0   : > { %v384_v34 = vmul.f32 %v978_v12, %v381_v31  ;;  %v388_v35 = vmul.f32 %v980_v13, %v385_v32  ;;  %v392_v36 = vmul.f32 %v982_v14, %v389_v33 }
  0xb2   : > { %v394_v37 = vsel %vm393_vm3, %v384_v34, 1.0  ;;  %v396_v38 = vsel %vm393_vm3, %v388_v35, 1.0  ;;  %v399_v39 = vsel %vm393_vm3, %v392_v36, 1.0 }
  0xb3   : > { %395 = vst [vmem:[%s964_s3] sm:$0x3] %v394_v37  ;;  %546 = vst [vmem:[%s964_s3 + $0x2] sm:$0x3] %v396_v38 }
  0xb4   : > { %547 = vst [vmem:[%s964_s3 + $0x4] sm:$0x3] %v399_v39 }
  0xb5   : > { %707 = shalt.err (!%p704_p12)
}
  0xb6   : > { %s708_s3 = scalar_lea.hbm %s999_s16, 128  ;;  %s712_s6 = scalar_lea.hbm %s1058_s2, 256 }
  0xb7   : > { %p709_p4 = scmp.ne.s32.totalorder %s999_s16, %s708_s3  ;;  %p713_p5 = scmp.lt.u32.totalorder %s999_s16, %s1058_s2 }
  0xb8   : > { %p714_p9 = scmp.lt.u32.totalorder %s712_s6, %s708_s3  ;;  %p716_p8 = scmp.lt.u32.totalorder %s708_s3, %s999_s16 }
  0xb9   : > { %p710_p10 = pnand %p709_p4, %p1071_p13 }
  0xba   : > { %p715_p3 = por %p714_p9, %p713_p5 }
  0xbb   : > { %p711_p11 = pneg %p710_p10 }
  0xbc   : > { %p717_p0 = por %p716_p8, %p715_p3 }
  0xbe   : > { %p718_p2 = pnand %p717_p0, %p711_p11 }
  0xc0   : > { %721 = shalt.err (!%p718_p2)
}
  0xc1   : > { %s787_s18 = smov 32   ;;  %s788_s24 = smov 2  }
  0xc2   : > { %562 = dma.vmem_to_hbm [thread:$0]  (%p1071_p13), %s1002_s29, 128, %s999_s16, %s405_s15, %s787_s18, %s787_s18, %s788_s24  }
  0xc3 PF: > { %s434_s19 = sand.u32 1, %s760_s9   ;;  %p1072_p6 = scmp.ne.s32.totalorder %s1066_s21, 0 }
  0xc4   : > { %p1073_p1 = scmp.ge.s32.totalorder %s780_s14, 2  ;;  %s435_s12 = scalar_lea.sflag [#allocation4], %s434_s19 }
  0xc6   : > { %p573_p7 = pnand %p1073_p1, %p1072_p6 }
  0xc8   : > { %755 = dma.done.wait (!%p573_p7), %s435_s12, 128  }
  0xc9   : > { %757 = vsyncadd (!%p573_p7), %s435_s12, 4294967168  ;;  %s19_s14 = sadd.s32 1, %s780_s14   ;;  %s1074_s9 = smov %s764_s10 }
  0xca   : > { %p16_p12 = scmp.ge.s32.totalorder %s19_s14, 4   ;;  %s1075_s10 = smov %s768_s11 }
  0xcb   : > { %s1076_s11 = smov %s905_s4  ;;  %s1077_s12 = smov %s776_s13 }
  0xcc   : > { %s1078_s13 = smov %s1080_s25  ;;  %18 = sbr.rel (!%p16_p12) target bundleno = 7 (0x7), region = 96 }
  0xd3   :  { %440 = vsyncpa [#allocation3], 1 }
  0xd4   :  { %442 = vsyncpa [#allocation3 + $0x1], 1 }
  0xd5   :  { %443 = vsyncpa [#allocation4], 1 }
  0xd6   :  { %445 = vsyncpa [#allocation4 + $0x1], 1 }
  0xd7   :  { %446 = vsyncpa [#allocation5], 1 }
  0xd8   :  { %448 = vsyncpa [#allocation5 + $0x1], 1 }

</bundles_post_ra>
